<compile_context>
chip_gen: v5e
topology: v5e:2x2
jax: 0.10.0
libtpu: 0.0.40
codegen_flags: <defaults>
</compile_context>

<pallas_src>
import functools

import jax
import jax.numpy as jnp
from jax import lax
from jax.experimental import pallas as pl
from jax.experimental.pallas import tpu as pltpu


def _conv_bn_lrelu_kernel(x_ref, w_ref, aff_ref, o_ref, *, hp, pad_w, neg_slope):
    """One (batch element, C_out-tile) grid step.

    x_ref  : (C_in, NPAD)    bf16  zero-padded, spatially-flattened activation
    w_ref  : (9, TCo, C_in)  bf16  3x3 conv taps for this output-channel tile
    aff_ref: (2, TCo, 1)     f32   [scale; shift] = folded conv-bias + BatchNorm
    o_ref  : (TCo, hp)       f32   flattened (padded-width) output tile
    """
    tco = o_ref.shape[0]
    acc = jnp.zeros((tco, hp), jnp.float32)
    # 3x3 conv as 9 shifted matmuls; shift offsets are static Python ints.
    for k in range(9):
        dh, dw = divmod(k, 3)
        off = dh * pad_w + dw
        patch = x_ref[:, off:off + hp]                     # (C_in, hp) static slice
        acc = acc + jnp.dot(w_ref[k], patch,
                            preferred_element_type=jnp.float32)
    scale = aff_ref[0]                                     # (TCo, 1) f32
    shift = aff_ref[1]                                     # (TCo, 1) f32
    y = acc * scale + shift                                # conv bias + BN (eval) folded
    y = jnp.where(y >= 0, y, neg_slope * y)                # LeakyReLU
    o_ref[...] = y.astype(o_ref.dtype)


def _pick_cout_tile(c_out):
    # Prefer >=2 output-channel tiles (pipelining + 2-TC sharding on v7x) with a
    # sublane-friendly (multiple-of-8) tile size; fall back to the full extent.
    for t in (256, 128, 64, 32, 16, 8):
        if t < c_out and c_out % t == 0:
            return t
    return c_out


def conv_dropout_norm_nonlin(x, conv_w, conv_b, bn_gamma, bn_beta, bn_mean, bn_var,
                             *, eps=1e-5, negative_slope=0.01,
                             compute_dtype=jnp.bfloat16):
    """ConvDropoutNormNonlin forward (eval mode). NCHW in -> NCHW out.

    x      : (B, C_in, H, W) float32
    conv_w : (C_out, C_in, 3, 3)
    conv_b : (C_out,)
    bn_*   : (C_out,)  BatchNorm2d affine params + running statistics
    returns: (B, C_out, H, W) float32
    """
    B, C_in, H, W = x.shape
    C_out = conv_w.shape[0]
    P = W + 2                      # padded width
    HP = H * P                     # flattened output extent (padded-width coords)
    NPAD = (H + 3) * P             # flattened padded input (1 top + 2 bottom pad rows)

    # Fold conv bias + eval-mode BatchNorm into a single per-channel scale/shift.
    scale = bn_gamma / jnp.sqrt(bn_var + eps)
    shift = bn_beta + (conv_b - bn_mean) * scale
    affine = jnp.stack([scale, shift]).astype(jnp.float32).reshape(2, C_out, 1)

    # (C_out, C_in, 3, 3) -> (9, C_out, C_in): one matmul weight per conv tap.
    w9 = jnp.transpose(conv_w.reshape(C_out, C_in, 9), (2, 0, 1)).astype(compute_dtype)

    # Zero-pad spatial dims (top 1, bottom 2, left 1, right 1) and flatten them.
    # NCHW layout is preserved, so no activation transpose is ever materialized.
    xp = jnp.pad(x.astype(compute_dtype), ((0, 0), (0, 0), (1, 2), (1, 1)))
    xp = xp.reshape(B, C_in, NPAD)

    tco = _pick_cout_tile(C_out)
    kernel = functools.partial(_conv_bn_lrelu_kernel, hp=HP, pad_w=P,
                               neg_slope=float(negative_slope))

    out_flat = pl.pallas_call(
        kernel,
        out_shape=jax.ShapeDtypeStruct((B, C_out, HP), jnp.float32),
        grid_spec=pltpu.PrefetchScalarGridSpec(
            num_scalar_prefetch=0,
            grid=(B, C_out // tco),
            in_specs=[
                # Activation: block index constant along the channel-tile axis ->
                # DMA'd once per batch element, resident across channel tiles.
                pl.BlockSpec((None, C_in, NPAD), lambda b, c: (b, 0, 0)),
                pl.BlockSpec((9, tco, C_in), lambda b, c: (0, c, 0)),
                pl.BlockSpec((2, tco, 1), lambda b, c: (0, c, 0)),
            ],
            out_specs=pl.BlockSpec((None, tco, HP), lambda b, c: (b, c, 0)),
        ),
        compiler_params=pltpu.CompilerParams(
            dimension_semantics=("parallel", "parallel"),
            vmem_limit_bytes=48 * 1024 * 1024,   # safe cap on v5e/v6e/v7x
        ),
    )(xp, w9, affine)

    # Drop the 2 padded-width columns per row: (B, C_out, H*P) -> (B, C_out, H, W).
    return out_flat.reshape(B, C_out, H, P)[:, :, :, :W]


if __name__ == "__main__":
    B, C_in, H, W, C_out = 2, 4, 16, 16, 32

    key = jax.random.PRNGKey(0)
    ks = jax.random.split(key, 7)
    x        = jax.random.normal(ks[0], (B, C_in, H, W), jnp.float32)
    conv_w   = jax.random.normal(ks[1], (C_out, C_in, 3, 3), jnp.float32) * 0.1
    conv_b   = jax.random.normal(ks[2], (C_out,), jnp.float32) * 0.1
    bn_gamma = 1.0 + 0.1 * jax.random.normal(ks[3], (C_out,), jnp.float32)
    bn_beta  = 0.1 * jax.random.normal(ks[4], (C_out,), jnp.float32)
    bn_mean  = 0.1 * jax.random.normal(ks[5], (C_out,), jnp.float32)
    bn_var   = 0.5 + jnp.abs(jax.random.normal(ks[6], (C_out,), jnp.float32))

    out = conv_dropout_norm_nonlin(x, conv_w, conv_b, bn_gamma, bn_beta,
                                   bn_mean, bn_var)
    out = jax.block_until_ready(out)

    # Pure-JAX f32 reference: Conv2d -> Dropout (eval: identity) -> BatchNorm (eval)
    # -> LeakyReLU(0.01).
    y = lax.conv_general_dilated(x, conv_w, window_strides=(1, 1),
                                 padding=((1, 1), (1, 1)),
                                 dimension_numbers=("NCHW", "OIHW", "NCHW"))
    y = y + conv_b[None, :, None, None]
    y = (y - bn_mean[None, :, None, None]) / jnp.sqrt(bn_var + 1e-5)[None, :, None, None]
    y = y * bn_gamma[None, :, None, None] + bn_beta[None, :, None, None]
    ref = jnp.where(y >= 0, y, 0.01 * y)

    assert out.shape == (B, C_out, H, W)
    max_err = float(jnp.max(jnp.abs(out - ref)))
    assert jnp.allclose(out, ref, atol=3e-2, rtol=3e-2), f"max abs err {max_err}"

    print("KERNEL_OK")
</pallas_src>

<mosaic_0001>
module attributes {stable_mosaic.version = 11 : i64} {
  func.func @_conv_bn_lrelu_kernel(%arg0: i32, %arg1: i32, %arg2: memref<1x4x342xbf16, #tpu.memory_space<vmem>>, %arg3: memref<9x16x4xbf16, #tpu.memory_space<vmem>>, %arg4: memref<2x16x1xf32, #tpu.memory_space<vmem>>, %arg5: memref<1x16x288xf32, #tpu.memory_space<vmem>>) attributes {dimension_semantics = [#tpu.dimension_semantics<parallel>, #tpu.dimension_semantics<parallel>], iteration_bounds = array<i64: 2, 2>, scalar_prefetch = 0 : i64, scratch_operands = 0 : i64, tpu.core_type = #tpu.core_type<tc>, window_params = [{transform_indices = @transform_0, window_bounds = array<i64: 1, 4, 342>}, {transform_indices = @transform_1, window_bounds = array<i64: 9, 16, 4>}, {transform_indices = @transform_2, window_bounds = array<i64: 2, 16, 1>}, {transform_indices = @transform_3, window_bounds = array<i64: 1, 16, 288>}]} {
    %cst = arith.constant 0.000000e+00 : f32
    %0 = vector.broadcast %cst : f32 to vector<16x288xf32>
    %c0 = arith.constant 0 : index
    %c0_0 = arith.constant 0 : index
    %c0_1 = arith.constant 0 : index
    %1 = vector.load %arg2[%c0, %c0_0, %c0_1] : memref<1x4x342xbf16, #tpu.memory_space<vmem>>, vector<1x4x288xbf16>
    %2 = vector.shape_cast %1 : vector<1x4x288xbf16> to vector<4x288xbf16>
    %c0_2 = arith.constant 0 : index
    %c0_3 = arith.constant 0 : index
    %c0_4 = arith.constant 0 : index
    %3 = vector.load %arg3[%c0_2, %c0_3, %c0_4] : memref<9x16x4xbf16, #tpu.memory_space<vmem>>, vector<1x16x4xbf16>
    %4 = vector.shape_cast %3 : vector<1x16x4xbf16> to vector<16x4xbf16>
    %cst_5 = arith.constant dense<0.000000e+00> : vector<16x288xf32>
    %5 = tpu.matmul %4, %2, %cst_5 {dimension_numbers = #tpu.dot_dimension_numbers<[1], [0], [0], [1], [0, 0, 1, 1], [], []>} : vector<16x4xbf16>, vector<4x288xbf16>, vector<16x288xf32> -> vector<16x288xf32>
    %6 = arith.addf %0, %5 : vector<16x288xf32>
    %c0_6 = arith.constant 0 : index
    %c0_7 = arith.constant 0 : index
    %c1 = arith.constant 1 : index
    %7 = vector.load %arg2[%c0_6, %c0_7, %c1] : memref<1x4x342xbf16, #tpu.memory_space<vmem>>, vector<1x4x288xbf16>
    %8 = vector.shape_cast %7 : vector<1x4x288xbf16> to vector<4x288xbf16>
    %c1_8 = arith.constant 1 : index
    %c0_9 = arith.constant 0 : index
    %c0_10 = arith.constant 0 : index
    %9 = vector.load %arg3[%c1_8, %c0_9, %c0_10] : memref<9x16x4xbf16, #tpu.memory_space<vmem>>, vector<1x16x4xbf16>
    %10 = vector.shape_cast %9 : vector<1x16x4xbf16> to vector<16x4xbf16>
    %cst_11 = arith.constant dense<0.000000e+00> : vector<16x288xf32>
    %11 = tpu.matmul %10, %8, %cst_11 {dimension_numbers = #tpu.dot_dimension_numbers<[1], [0], [0], [1], [0, 0, 1, 1], [], []>} : vector<16x4xbf16>, vector<4x288xbf16>, vector<16x288xf32> -> vector<16x288xf32>
    %12 = arith.addf %6, %11 : vector<16x288xf32>
    %c0_12 = arith.constant 0 : index
    %c0_13 = arith.constant 0 : index
    %c2 = arith.constant 2 : index
    %13 = vector.load %arg2[%c0_12, %c0_13, %c2] : memref<1x4x342xbf16, #tpu.memory_space<vmem>>, vector<1x4x288xbf16>
    %14 = vector.shape_cast %13 : vector<1x4x288xbf16> to vector<4x288xbf16>
    %c2_14 = arith.constant 2 : index
    %c0_15 = arith.constant 0 : index
    %c0_16 = arith.constant 0 : index
    %15 = vector.load %arg3[%c2_14, %c0_15, %c0_16] : memref<9x16x4xbf16, #tpu.memory_space<vmem>>, vector<1x16x4xbf16>
    %16 = vector.shape_cast %15 : vector<1x16x4xbf16> to vector<16x4xbf16>
    %cst_17 = arith.constant dense<0.000000e+00> : vector<16x288xf32>
    %17 = tpu.matmul %16, %14, %cst_17 {dimension_numbers = #tpu.dot_dimension_numbers<[1], [0], [0], [1], [0, 0, 1, 1], [], []>} : vector<16x4xbf16>, vector<4x288xbf16>, vector<16x288xf32> -> vector<16x288xf32>
    %18 = arith.addf %12, %17 : vector<16x288xf32>
    %c0_18 = arith.constant 0 : index
    %c0_19 = arith.constant 0 : index
    %c18 = arith.constant 18 : index
    %19 = vector.load %arg2[%c0_18, %c0_19, %c18] : memref<1x4x342xbf16, #tpu.memory_space<vmem>>, vector<1x4x288xbf16>
    %20 = vector.shape_cast %19 : vector<1x4x288xbf16> to vector<4x288xbf16>
    %c3 = arith.constant 3 : index
    %c0_20 = arith.constant 0 : index
    %c0_21 = arith.constant 0 : index
    %21 = vector.load %arg3[%c3, %c0_20, %c0_21] : memref<9x16x4xbf16, #tpu.memory_space<vmem>>, vector<1x16x4xbf16>
    %22 = vector.shape_cast %21 : vector<1x16x4xbf16> to vector<16x4xbf16>
    %cst_22 = arith.constant dense<0.000000e+00> : vector<16x288xf32>
    %23 = tpu.matmul %22, %20, %cst_22 {dimension_numbers = #tpu.dot_dimension_numbers<[1], [0], [0], [1], [0, 0, 1, 1], [], []>} : vector<16x4xbf16>, vector<4x288xbf16>, vector<16x288xf32> -> vector<16x288xf32>
    %24 = arith.addf %18, %23 : vector<16x288xf32>
    %c0_23 = arith.constant 0 : index
    %c0_24 = arith.constant 0 : index
    %c19 = arith.constant 19 : index
    %25 = vector.load %arg2[%c0_23, %c0_24, %c19] : memref<1x4x342xbf16, #tpu.memory_space<vmem>>, vector<1x4x288xbf16>
    %26 = vector.shape_cast %25 : vector<1x4x288xbf16> to vector<4x288xbf16>
    %c4 = arith.constant 4 : index
    %c0_25 = arith.constant 0 : index
    %c0_26 = arith.constant 0 : index
    %27 = vector.load %arg3[%c4, %c0_25, %c0_26] : memref<9x16x4xbf16, #tpu.memory_space<vmem>>, vector<1x16x4xbf16>
    %28 = vector.shape_cast %27 : vector<1x16x4xbf16> to vector<16x4xbf16>
    %cst_27 = arith.constant dense<0.000000e+00> : vector<16x288xf32>
    %29 = tpu.matmul %28, %26, %cst_27 {dimension_numbers = #tpu.dot_dimension_numbers<[1], [0], [0], [1], [0, 0, 1, 1], [], []>} : vector<16x4xbf16>, vector<4x288xbf16>, vector<16x288xf32> -> vector<16x288xf32>
    %30 = arith.addf %24, %29 : vector<16x288xf32>
    %c0_28 = arith.constant 0 : index
    %c0_29 = arith.constant 0 : index
    %c20 = arith.constant 20 : index
    %31 = vector.load %arg2[%c0_28, %c0_29, %c20] : memref<1x4x342xbf16, #tpu.memory_space<vmem>>, vector<1x4x288xbf16>
    %32 = vector.shape_cast %31 : vector<1x4x288xbf16> to vector<4x288xbf16>
    %c5 = arith.constant 5 : index
    %c0_30 = arith.constant 0 : index
    %c0_31 = arith.constant 0 : index
    %33 = vector.load %arg3[%c5, %c0_30, %c0_31] : memref<9x16x4xbf16, #tpu.memory_space<vmem>>, vector<1x16x4xbf16>
    %34 = vector.shape_cast %33 : vector<1x16x4xbf16> to vector<16x4xbf16>
    %cst_32 = arith.constant dense<0.000000e+00> : vector<16x288xf32>
    %35 = tpu.matmul %34, %32, %cst_32 {dimension_numbers = #tpu.dot_dimension_numbers<[1], [0], [0], [1], [0, 0, 1, 1], [], []>} : vector<16x4xbf16>, vector<4x288xbf16>, vector<16x288xf32> -> vector<16x288xf32>
    %36 = arith.addf %30, %35 : vector<16x288xf32>
    %c0_33 = arith.constant 0 : index
    %c0_34 = arith.constant 0 : index
    %c36 = arith.constant 36 : index
    %37 = vector.load %arg2[%c0_33, %c0_34, %c36] : memref<1x4x342xbf16, #tpu.memory_space<vmem>>, vector<1x4x288xbf16>
    %38 = vector.shape_cast %37 : vector<1x4x288xbf16> to vector<4x288xbf16>
    %c6 = arith.constant 6 : index
    %c0_35 = arith.constant 0 : index
    %c0_36 = arith.constant 0 : index
    %39 = vector.load %arg3[%c6, %c0_35, %c0_36] : memref<9x16x4xbf16, #tpu.memory_space<vmem>>, vector<1x16x4xbf16>
    %40 = vector.shape_cast %39 : vector<1x16x4xbf16> to vector<16x4xbf16>
    %cst_37 = arith.constant dense<0.000000e+00> : vector<16x288xf32>
    %41 = tpu.matmul %40, %38, %cst_37 {dimension_numbers = #tpu.dot_dimension_numbers<[1], [0], [0], [1], [0, 0, 1, 1], [], []>} : vector<16x4xbf16>, vector<4x288xbf16>, vector<16x288xf32> -> vector<16x288xf32>
    %42 = arith.addf %36, %41 : vector<16x288xf32>
    %c0_38 = arith.constant 0 : index
    %c0_39 = arith.constant 0 : index
    %c37 = arith.constant 37 : index
    %43 = vector.load %arg2[%c0_38, %c0_39, %c37] : memref<1x4x342xbf16, #tpu.memory_space<vmem>>, vector<1x4x288xbf16>
    %44 = vector.shape_cast %43 : vector<1x4x288xbf16> to vector<4x288xbf16>
    %c7 = arith.constant 7 : index
    %c0_40 = arith.constant 0 : index
    %c0_41 = arith.constant 0 : index
    %45 = vector.load %arg3[%c7, %c0_40, %c0_41] : memref<9x16x4xbf16, #tpu.memory_space<vmem>>, vector<1x16x4xbf16>
    %46 = vector.shape_cast %45 : vector<1x16x4xbf16> to vector<16x4xbf16>
    %cst_42 = arith.constant dense<0.000000e+00> : vector<16x288xf32>
    %47 = tpu.matmul %46, %44, %cst_42 {dimension_numbers = #tpu.dot_dimension_numbers<[1], [0], [0], [1], [0, 0, 1, 1], [], []>} : vector<16x4xbf16>, vector<4x288xbf16>, vector<16x288xf32> -> vector<16x288xf32>
    %48 = arith.addf %42, %47 : vector<16x288xf32>
    %c0_43 = arith.constant 0 : index
    %c0_44 = arith.constant 0 : index
    %c38 = arith.constant 38 : index
    %49 = vector.load %arg2[%c0_43, %c0_44, %c38] : memref<1x4x342xbf16, #tpu.memory_space<vmem>>, vector<1x4x288xbf16>
    %50 = vector.shape_cast %49 : vector<1x4x288xbf16> to vector<4x288xbf16>
    %c8 = arith.constant 8 : index
    %c0_45 = arith.constant 0 : index
    %c0_46 = arith.constant 0 : index
    %51 = vector.load %arg3[%c8, %c0_45, %c0_46] : memref<9x16x4xbf16, #tpu.memory_space<vmem>>, vector<1x16x4xbf16>
    %52 = vector.shape_cast %51 : vector<1x16x4xbf16> to vector<16x4xbf16>
    %cst_47 = arith.constant dense<0.000000e+00> : vector<16x288xf32>
    %53 = tpu.matmul %52, %50, %cst_47 {dimension_numbers = #tpu.dot_dimension_numbers<[1], [0], [0], [1], [0, 0, 1, 1], [], []>} : vector<16x4xbf16>, vector<4x288xbf16>, vector<16x288xf32> -> vector<16x288xf32>
    %54 = arith.addf %48, %53 : vector<16x288xf32>
    %c0_48 = arith.constant 0 : index
    %c0_49 = arith.constant 0 : index
    %c0_50 = arith.constant 0 : index
    %55 = vector.load %arg4[%c0_48, %c0_49, %c0_50] : memref<2x16x1xf32, #tpu.memory_space<vmem>>, vector<1x16x1xf32>
    %56 = vector.shape_cast %55 : vector<1x16x1xf32> to vector<16x1xf32>
    %c1_51 = arith.constant 1 : index
    %c0_52 = arith.constant 0 : index
    %c0_53 = arith.constant 0 : index
    %57 = vector.load %arg4[%c1_51, %c0_52, %c0_53] : memref<2x16x1xf32, #tpu.memory_space<vmem>>, vector<1x16x1xf32>
    %58 = vector.shape_cast %57 : vector<1x16x1xf32> to vector<16x1xf32>
    %59 = vector.broadcast %56 : vector<16x1xf32> to vector<16x288xf32>
    %60 = arith.mulf %54, %59 : vector<16x288xf32>
    %61 = vector.broadcast %58 : vector<16x1xf32> to vector<16x288xf32>
    %62 = arith.addf %60, %61 : vector<16x288xf32>
    %cst_54 = arith.constant 0.000000e+00 : f32
    %63 = vector.broadcast %cst_54 : f32 to vector<16x288xf32>
    %64 = arith.cmpf oge, %62, %63 : vector<16x288xf32>
    %cst_55 = arith.constant 0.00999999977 : f32
    %65 = vector.broadcast %cst_55 : f32 to vector<16x288xf32>
    %66 = arith.mulf %65, %62 : vector<16x288xf32>
    %67 = arith.select %64, %62, %66 : vector<16x288xi1>, vector<16x288xf32>
    %c0_56 = arith.constant 0 : index
    %c0_57 = arith.constant 0 : index
    %c0_58 = arith.constant 0 : index
    %68 = vector.load %arg5[%c0_56, %c0_57, %c0_58] : memref<1x16x288xf32, #tpu.memory_space<vmem>>, vector<1x16x288xf32>
    %69 = vector.shape_cast %68 : vector<1x16x288xf32> to vector<16x288xf32>
    %70 = vector.shape_cast %67 : vector<16x288xf32> to vector<1x16x288xf32>
    tpu.vector_store %arg5[%c0_56, %c0_57, %c0_58], %70 {strides = array<i32>} : memref<1x16x288xf32, #tpu.memory_space<vmem>>, vector<1x16x288xf32>,
    return
  }
  func.func @transform_0(%arg0: i32, %arg1: i32) -> (i32, i32, i32) {
    %c0_i32 = arith.constant 0 : i32
    %c0_i32_0 = arith.constant 0 : i32
    %c0_i32_1 = arith.constant 0 : i32
    return %arg0, %c0_i32, %c0_i32_0 : i32, i32, i32
  }
  func.func @transform_1(%arg0: i32, %arg1: i32) -> (i32, i32, i32) {
    %c0_i32 = arith.constant 0 : i32
    %c0_i32_0 = arith.constant 0 : i32
    %c0_i32_1 = arith.constant 0 : i32
    return %c0_i32, %arg1, %c0_i32_0 : i32, i32, i32
  }
  func.func @transform_2(%arg0: i32, %arg1: i32) -> (i32, i32, i32) {
    %c0_i32 = arith.constant 0 : i32
    %c0_i32_0 = arith.constant 0 : i32
    %c0_i32_1 = arith.constant 0 : i32
    return %c0_i32, %arg1, %c0_i32_0 : i32, i32, i32
  }
  func.func @transform_3(%arg0: i32, %arg1: i32) -> (i32, i32, i32) {
    %c0_i32 = arith.constant 0 : i32
    %c0_i32_0 = arith.constant 0 : i32
    return %arg0, %arg1, %c0_i32 : i32, i32, i32
  }
}

</mosaic_0001>

<bundles_post_ra>
// kernel: tpu_custom_call.1
= control target key start
LH: loop header
LB: loop body
LE: loop exit
PB: predicated region body
PF: predicated region fallthrough
CT: control target
= control target key end

     0   :  { %8 = vsyncpa [#allocation5], 0  ;;  %s1966_s0 = inlined_call_operand.vmem [shape: bf16[2,4,342], index: 0, kind: input, shape index: {}]   ;;  %s1967_s1 = inlined_call_operand.vmem [shape: bf16[9,32,4], index: 1, kind: input, shape index: {}]   ;;  %s1968_s2 = inlined_call_operand.vmem [shape: f32[2,32,1], index: 2, kind: input, shape index: {}]   ;;  %s1969_s3 = inlined_call_operand.hbm [shape: f32[2,32,288], index: 3, kind: output, shape index: {}]  }
   0x1   :  { %10 = vsyncpa [#allocation5 + $0x1], 0  ;;  %s1685_s12 = smov 0   ;;  %s1687_s13 = smov 0  }
   0x2   :  { %s1689_s14 = smov 0   ;;  %s1691_s15 = smov 0  }
   0x3   :  { %s1693_s16 = smov 0   ;;  %s1695_s17 = smov 0  }
   0x4   :  { %s1697_s18 = smov 0   ;;  %s1699_s19 = smov 0  }
   0x5   :  { %s1701_s20 = smov 0   ;;  %s1703_s21 = smov 0  }
   0x6 LB: > { %s1326_s22 = sadd.s32 4294967295, %s1652_s21   ;;  %s1327_s23 = sadd.s32 4294967294, %s1652_s21   ;;  %s1652_s21 = sphi %s1703_s21, %s16_s21   ;;  %s1648_s20 = sphi %s1701_s20, %s1981_s20   ;;  %s1644_s19 = sphi %s1699_s19, %s1980_s19   ;;  %s1640_s18 = sphi %s1697_s18, %s1979_s18   ;;  %s1636_s17 = sphi %s1695_s17, %s1978_s17   ;;  %s1632_s16 = sphi %s1693_s16, %s1977_s16   ;;  %s1628_s15 = sphi %s1691_s15, %s1976_s15   ;;  %s1624_s14 = sphi %s1689_s14, %s1975_s14   ;;  %s1620_s13 = sphi %s1687_s13, %s1974_s13   ;;  %s1616_s12 = sphi %s1685_s12, %s1973_s12  }
   0x7   : > { %s25_s24 = sadd.s32 1, %s1644_s19  ;;  %s28_s25 = sadd.s32 1, %s1648_s20 }
   0x8   : > { %p26_p0 = scmp.ge.s32.totalorder %s25_s24, 2  ;;  %s61_s26 = sadd.s32 1, %s1632_s16 }
   0x9   : > { %p68_p1 = scmp.ne.s32.totalorder %s1632_s16, %s1628_s15  ;;  %p69_p2 = scmp.eq.s32.totalorder %s1652_s21, 0 }
   0xa   : > { %s1983_s24 = smov (%p26_p0, %s25_s24), 0  ;;  %s1985_s25 = smov (!%p26_p0, %s28_s25), %s1648_s20 }
   0xb   : > { %s58_s27 = ssub.s32 %s1644_s19, %s1983_s24  ;;  %p1748_p3 = por %p69_p2, %p68_p1 }
   0xc   : > { %p30_p4 = scmp.ge.s32.totalorder %s1985_s25, 2  ;;  %p59_p5 = scmp.eq.s32.totalorder %s58_s27, 0 }
   0xd   : > { %s115_s29 = sadd.s32 1, %s1624_s14  ;;  %p125_p6 = scmp.ne.s32.totalorder %s1624_s14, %s1620_s13 }
   0xe   : > { %s1987_s25 = smov (%p30_p4, %s1985_s25), 0  ;;  %p126_p7 = scmp.eq.s32.totalorder %s1326_s22, 3 }
   0xf   : > { %s1758_s30 = scalar_select %p59_p5, %s1632_s16, %s61_s26  }
  0x10   : > { %s110_s4 = ssub.s32 %s1648_s20, %s1987_s25  ;;  %p131_p8 = scmp.ne.s32.totalorder %s1620_s13, %s1616_s12 }
  0x11   : > { %s112_s5 = sor.u32 %s110_s4, %s58_s27  ;;  %p1764_p10 = por %p126_p7, %p125_p6 }
  0x12   : > { %p113_p9 = scmp.eq.s32.totalorder %s112_s5, 0  ;;  %p132_p11 = scmp.eq.s32.totalorder %s1327_s23, 3 }
  0x13   : > { %p1329_p13 = scmp.ge.s32.totalorder %s1652_s21, 4 }
  0x14   : > { %s1769_s7 = scalar_select %p113_p9, %s1624_s14, %s115_s29  }
  0x15   : > { %p1771_p12 = por %p132_p11, %p131_p8  ;;  %148 = sbr.rel (%p1329_p13) target bundleno = 47 (0x2f), region = 16 }
  0x1a   : > { %159 = sbr.rel (!%p1748_p3) target bundleno = 39 (0x27), region = 24  ;;  %s161_s9 = sand.u32 (%p1748_p3), 1, %s1632_s16  }
  0x1b   : > { %s1424_s10 = sshll.u32 (%p1748_p3), %s1644_s19, 3  ;;  %s1435_s11 = smul.u32 (%p1748_p3), 72, %s161_s9 }
  0x1c   : > { %s166_s23 = scalar_lea.vmem (%p1748_p3), %s1967_s1, %s1424_s10 }
  0x1d   : > { %v183_v0 = vld [vmem:[%s166_s23] sm:$0xff] (%p1748_p3)   ;;  %v187_v1 = vld [vmem:[%s166_s23 + $0x10] sm:$0xff] (%p1748_p3)   ;;  %s163_s27 = scalar_lea.vmem (%p1748_p3), [#allocation2], %s1435_s11 }
  0x1e   : > { %v191_v2 = vld [vmem:[%s166_s23 + $0x20] sm:$0xff] (%p1748_p3)   ;;  %184 = vst [vmem:[%s163_s27] sm:$0xff] (%p1748_p3), %v183_v0   ;;  %v195_v3 = vld [vmem:[%s166_s23 + $0x30] sm:$0xff] (%p1748_p3)  }
  0x1f   : > { %188 = vst [vmem:[%s163_s27 + $0x8] sm:$0xff] %v187_v1   ;;  %v199_v4 = vld [vmem:[%s166_s23 + $0x40] sm:$0xff]   ;;  %v203_v5 = vld [vmem:[%s166_s23 + $0x50] sm:$0xff]  }
  0x20   : > { %192 = vst [vmem:[%s163_s27 + $0x10] sm:$0xff] %v191_v2   ;;  %v207_v6 = vld [vmem:[%s166_s23 + $0x60] sm:$0xff]   ;;  %v211_v7 = vld [vmem:[%s166_s23 + $0x70] sm:$0xff]  }
  0x21   : > { %196 = vst [vmem:[%s163_s27 + $0x18] sm:$0xff] %v195_v3   ;;  %v215_v8 = vld [vmem:[%s166_s23 + $0x80] sm:$0xff]  }
  0x22   : > { %200 = vst [vmem:[%s163_s27 + $0x20] sm:$0xff] %v199_v4  }
  0x23   : > { %204 = vst [vmem:[%s163_s27 + $0x28] sm:$0xff] %v203_v5  }
  0x24   : > { %208 = vst [vmem:[%s163_s27 + $0x30] sm:$0xff] %v207_v6  }
  0x25   : > { %212 = vst [vmem:[%s163_s27 + $0x38] sm:$0xff] %v211_v7  }
  0x26   : > { %216 = vst [vmem:[%s163_s27 + $0x40] sm:$0xff] %v215_v8  }
  0x27 PF: > { %278 = sbr.rel (!%p1748_p3) target bundleno = 47 (0x2f), region = 65  ;;  %s280_s29 = sand.u32 (%p1748_p3), 1, %s1632_s16  }
  0x28   : > { %s1425_s4 = sshll.u32 (%p1748_p3), %s1644_s19, 4  ;;  %s1332_s5 = sshll.u32 (%p1748_p3), %s280_s29, 5 }
  0x29   : > { %s285_s11 = scalar_lea.vmem (%p1748_p3), %s1968_s2, %s1425_s4  ;;  %s282_s22 = scalar_lea.vmem (%p1748_p3), [#allocation3], %s1332_s5 }
  0x2a   : > { %v320_v9 = vld [vmem:[%s285_s11] sm:$0xff] (%p1748_p3)  ;;  %v322_v10 = vld [vmem:[%s285_s11 + $0x8] sm:$0xff] (%p1748_p3) }
  0x2b   : > { %v324_v11 = vld [vmem:[%s285_s11 + $0x20] sm:$0xff] (%p1748_p3)  ;;  %321 = vst [vmem:[%s282_s22] sm:$0xff] (%p1748_p3), %v320_v9  ;;  %v326_v12 = vld [vmem:[%s285_s11 + $0x28] sm:$0xff] (%p1748_p3) }
  0x2c   : > { %323 = vst [vmem:[%s282_s22 + $0x8] sm:$0xff] %v322_v10 }
  0x2d   : > { %325 = vst [vmem:[%s282_s22 + $0x10] sm:$0xff] %v324_v11 }
  0x2e   : > { %327 = vst [vmem:[%s282_s22 + $0x18] sm:$0xff] %v326_v12 }
  0x2f PF: > { %p1335_p0 = scmp.ge.s32.totalorder %s1652_s21, 1  ;;  %p332_p1 = scmp.lt.s32.totalorder %s1652_s21, 5 }
  0x31   : > { %p333_p2 = pnand %p1335_p0, %p332_p1 }
  0x32   : > { %p378_p3 = scmp.lt.s32.totalorder (!%p333_p2), %s1640_s18, 1  ;;  %s1654_s4 = smov (!%p333_p2), 127  }
  0x33   : > { %336 = sbr.rel (%p333_p2) target bundleno = 442 (0x1ba), region = 103  ;;  %s1655_s5 = smov (!%p333_p2), 126  }
  0x34   : > { %s1656_s9 = smov (!%p333_p2), 110   ;;  %s1657_s10 = smov (!%p333_p2), 109  }
  0x35   : > { %s1658_s11 = smov (!%p333_p2), 108   ;;  %s1659_s22 = smov (!%p333_p2), 92  }
  0x36   : > { %s339_s23 = sand.u32 (!%p333_p2), 1, %s1628_s15   ;;  %s375_s15 = sand.u32 (!%p333_p2), 1, %s1620_s13  }
  0x37   : > { %s1436_s27 = smul.u32 (!%p333_p2), 72, %s339_s23 }
  0x38   : > { %s379_s28 = scalar_select %p378_p3, %s1640_s18, 1  ;;  %vm419_vm0 = vcmask 1041408   ;;  %vm415_vm1 = vcmask 31744   ;;  %vm412_vm2 = vcmask 1039360   ;;  %vm554_vm3 = vcmask 1031168  }
  0x39   : > { %vm640_vm4 = vcmask 900096   ;;  %vm726_vm5 = vcmask 891904   ;;  %vm812_vm6 = vcmask 883712   ;;  %vm898_vm7 = vcmask 752640  }
  0x3a   : > { %s1438_s26 = smul.u32 6, %s379_s28  ;;  %s1660_s28 = smov 91   ;;  %vm984_vm8 = vcmask 744448   ;;  %vm1070_vm9 = vcmask 736256   ;;  %vm1190_vm11 = vcmask 261120  }
  0x3c   : > { %s1797_s29 = scalar_lea.vmem %s1966_s0, %s1438_s26  ;;  %s1661_s26 = smov 90  }
  0x3d   : > { %v387_v13 = vld [vmem:[%s1797_s29] sm:$0x3f] }
  0x3e   : > { %399 = vst [vmem:[#allocation1] ss:$4 sm:$0xff] %v387_v13  ;;  %v531_v17 = vld [vmem:[%s1797_s29] sm:$0x3f] }
  0x3f   : > { %v617_v21 = vld [vmem:[%s1797_s29] sm:$0x3f] }
  0x40   : > { %v703_v25 = vld [vmem:[%s1797_s29] sm:$0x3f] }
  0x41   : > { %v789_v29 = vld [vmem:[%s1797_s29] sm:$0x3f] }
  0x42   : > { %v875_v33 = vld [vmem:[%s1797_s29] sm:$0x3f] }
  0x43   : > { %v961_v37 = vld [vmem:[%s1797_s29] sm:$0x3f] }
  0x44   : > { %v1047_v41 = vld [vmem:[%s1797_s29] sm:$0x3f]  ;;  %s1818_s29 = scalar_lea.vmem [#allocation2], %s1436_s27 }
  0x45   : > { %v404_v14 = vld.sshfl [vmem:[#allocation1 + $0x10] sm:$0xff pattern:$0x73625140]  ;;  %v402_v15 = vld.sshfl [vmem:[#allocation1 + $0x8] sm:$0xff pattern:$0x73625140] }
  0x46   : > { %410 = vrot.lane.b32.xlu0 %v404_v14, %s1654_s4  ;;  %408 = vrot.lane.b32.xlu1 %v402_v15, %s1654_s4  ;;  %v400_v16 = vld.sshfl [vmem:[#allocation1] sm:$0xff pattern:$0x73625140]  ;;  %v1426_v49 = vld [vmem:[%s1818_s29] sm:$0xff]  ;;  %v1427_v55 = vld [vmem:[%s1818_s29 + $0x8] sm:$0xff] }
  0x47   : > { %476 = vst [vmem:[#allocation1] ss:$4 sm:$0xff] %v387_v13  ;;  %v1428_v61 = vld [vmem:[%s1818_s29 + $0x10] sm:$0xff]  ;;  %v1429_v14 = vld [vmem:[%s1818_s29 + $0x18] sm:$0xff] }
  0x4e   : > { %406 = vrot.lane.b32.xlu0 %v400_v16, %s1654_s4  ;;  %v1801_v18 = vld.sshfl [vmem:[#allocation1] sm:$0xff pattern:$0x73625140]  ;;  %v1803_v19 = vld.sshfl [vmem:[#allocation1 + $0x8] sm:$0xff pattern:$0x73625140] }
  0x4f   : > { %v1805_v20 = vld.sshfl [vmem:[#allocation1 + $0x10] sm:$0xff pattern:$0x73625140]  ;;  %v483_v48 = vsel %vm419_vm0, %v1801_v18, 0  ;;  %v485_v0 = vsel %vm419_vm0, %v1803_v19, 0  ;;  %s1336_s4 = sshll.u32 %s339_s23, 5 }
  0x50   : > { %541 = vst [vmem:[#allocation1] ss:$4 sm:$0xff] %v531_v17  ;;  %496 = vmatpush.bf16.msra.mxu3 %v483_v48  ;;  %v487_v56 = vsel %vm419_vm0, %v1805_v20, 0 }
  0x53   : > { %1351 = vmatmul.msk.bf16.vlgmr.msra.gmra.mxu3 %vm415_vm1, %v1426_v49 }
  0x57   : > { %v542_v22 = vld.sshfl [vmem:[#allocation1] sm:$0xff pattern:$0x73625140]  ;;  %v544_v23 = vld.sshfl [vmem:[#allocation1 + $0x8] sm:$0xff pattern:$0x73625140] }
  0x58   : > { %548 = vrot.lane.b32.xlu1 %v542_v22, %s1655_s5  ;;  %550 = vrot.lane.b32.xlu2 %v544_v23, %s1655_s5  ;;  %v546_v24 = vld.sshfl [vmem:[#allocation1 + $0x10] sm:$0xff pattern:$0x73625140] }
  0x59   : > { %627 = vst [vmem:[#allocation1] ss:$4 sm:$0xff] %v617_v21 }
  0x60   : > { %v632_v26 = vld.sshfl [vmem:[#allocation1 + $0x10] sm:$0xff pattern:$0x73625140]  ;;  %v628_v27 = vld.sshfl [vmem:[#allocation1] sm:$0xff pattern:$0x73625140]  ;;  %552 = vrot.lane.b32.xlu2 %v546_v24, %s1655_s5 }
  0x61   : > { %638 = vrot.lane.b32.xlu1 %v632_v26, %s1656_s9  ;;  %v630_v28 = vld.sshfl [vmem:[#allocation1 + $0x8] sm:$0xff pattern:$0x73625140]  ;;  %s348_s5 = scalar_lea.vmem [#allocation3], %s1336_s4  ;;  %s1196_s4 = scalar_lea.sflag [#allocation5], %s375_s15 }
  0x62   : > { %636 = vrot.lane.b32.xlu0 %v630_v28, %s1656_s9  ;;  %713 = vst [vmem:[#allocation1] ss:$4 sm:$0xff] %v703_v25  ;;  %v1431_v28 = vld [vmem:[%s1818_s29 + $0x28] sm:$0xff] }
  0x68   : > { %634 = vrot.lane.b32.xlu2 %v628_v27, %s1656_s9  ;;  %s1437_s9 = smul.u32 48, %s375_s15 }
  0x69   : > { %v718_v30 = vld.sshfl [vmem:[#allocation1 + $0x10] sm:$0xff pattern:$0x73625140]  ;;  %v716_v31 = vld.sshfl [vmem:[#allocation1 + $0x8] sm:$0xff pattern:$0x73625140] }
  0x6a   : > { %724 = vrot.lane.b32.xlu0 %v718_v30, %s1657_s10  ;;  %v714_v32 = vld.sshfl [vmem:[#allocation1] sm:$0xff pattern:$0x73625140] }
  0x6b   : > { %720 = vrot.lane.b32.xlu1 %v714_v32, %s1657_s10  ;;  %799 = vst [vmem:[#allocation1] ss:$4 sm:$0xff] %v789_v29  ;;  %v1430_v29 = vld [vmem:[%s1818_s29 + $0x20] sm:$0xff] }
  0x70   : > { %722 = vrot.lane.b32.xlu2 %v716_v31, %s1657_s10  ;;  %s1439_s10 = smul.u32 6, %s1636_s17 }
  0x72   : > { %v802_v34 = vld.sshfl [vmem:[#allocation1 + $0x8] sm:$0xff pattern:$0x73625140]  ;;  %v800_v35 = vld.sshfl [vmem:[#allocation1] sm:$0xff pattern:$0x73625140] }
  0x73   : > { %808 = vrot.lane.b32.xlu1 %v802_v34, %s1658_s11  ;;  %806 = vrot.lane.b32.xlu0 %v800_v35, %s1658_s11  ;;  %v804_v36 = vld.sshfl [vmem:[#allocation1 + $0x10] sm:$0xff pattern:$0x73625140] }
  0x74   : > { %885 = vst [vmem:[#allocation1] ss:$4 sm:$0xff] %v875_v33 }
  0x7b   : > { %810 = vrot.lane.b32.xlu1 %v804_v36, %s1658_s11  ;;  %v890_v38 = vld.sshfl [vmem:[#allocation1 + $0x10] sm:$0xff pattern:$0x73625140]  ;;  %v888_v39 = vld.sshfl [vmem:[#allocation1 + $0x8] sm:$0xff pattern:$0x73625140] }
  0x7c   : > { %894 = vrot.lane.b32.xlu0 %v888_v39, %s1659_s22  ;;  %v886_v40 = vld.sshfl [vmem:[#allocation1] sm:$0xff pattern:$0x73625140]  ;;  %s1440_s11 = smul.u32 12, %s1640_s18 }
  0x7d   : > { %892 = vrot.lane.b32.xlu2 %v886_v40, %s1659_s22  ;;  %971 = vst [vmem:[#allocation1] ss:$4 sm:$0xff] %v961_v37 }
  0x7e   : > { %s1208_s17 = sadd.s32 %s1440_s11, %s1439_s10 }
  0x7f   : > { %s1421_s18 = sshll.u32 %s1208_s17, 3  ;;  %s1562_s17 = scalar_lea.hbm %s1969_s3, 192 }
  0x80   : > { %s1210_s23 = scalar_lea.hbm %s1969_s3, %s1421_s18 }
  0x84   : > { %v972_v42 = vld.sshfl [vmem:[#allocation1] sm:$0xff pattern:$0x73625140]  ;;  %v976_v43 = vld.sshfl [vmem:[#allocation1 + $0x10] sm:$0xff pattern:$0x73625140] }
  0x85   : > { %982 = vrot.lane.b32.xlu1 %v976_v43, %s1660_s28  ;;  %v974_v44 = vld.sshfl [vmem:[#allocation1 + $0x8] sm:$0xff pattern:$0x73625140]  ;;  %896 = vrot.lane.b32.xlu2 %v890_v38, %s1659_s22  ;;  %s1902_s22 = scalar_lea.vmem [#allocation4], %s1437_s9 }
  0x86   : > { %980 = vrot.lane.b32.xlu0 %v974_v44, %s1660_s28  ;;  %1057 = vst [vmem:[#allocation1] ss:$4 sm:$0xff] %v1047_v41  ;;  %s1211_s27 = sshll.u32 %s1902_s22, 4  ;;  %s1212_s27 = int_to_ptr.vmem [resolvable:$true] %s1211_s27 }
  0x8d   : > { %v1062_v45 = vld.sshfl [vmem:[#allocation1 + $0x10] sm:$0xff pattern:$0x73625140]  ;;  %v1058_v46 = vld.sshfl [vmem:[#allocation1] sm:$0xff pattern:$0x73625140]  ;;  %978 = vrot.lane.b32.xlu2 %v972_v42, %s1660_s28 }
  0x8e   : > { %1068 = vrot.lane.b32.xlu0 %v1062_v45, %s1661_s26  ;;  %1064 = vrot.lane.b32.xlu1 %v1058_v46, %s1661_s26  ;;  %v1060_v47 = vld.sshfl [vmem:[#allocation1 + $0x8] sm:$0xff pattern:$0x73625140]  ;;  %v1432_v45 = vld [vmem:[%s1818_s29 + $0x30] sm:$0xff] }
  0x95   : > { %1066 = vrot.lane.b32.xlu2 %v1060_v47, %s1661_s26 }
  0xb2   : > { %v551_v50 = vpop.permute.xlu2 %550 }
  0xb8   : > { %v411_v51 = vpop.permute.xlu0 %410  ;;  %v409_v52 = vpop.permute.xlu1 %408 }
  0xb9   : > { %v414_v53 = vsel %vm412_vm2, %v409_v52, %v411_v51  ;;  %v427_v54 = vsel %vm419_vm0, %v411_v51, 0 }
  0xba   : > { %v424_v57 = vsel %vm419_vm0, %v414_v53, 0  ;;  %464 = vmatpush.bf16.msra.mxu2 %v427_v54  ;;  %v553_v58 = vpop.permute.xlu2 %552 }
  0xbb   : > { %450 = vmatpush.bf16.msra.mxu1 %v424_v57  ;;  %v556_v59 = vsel %vm554_vm3, %v551_v50, %v553_v58  ;;  %v567_v2 = vsel %vm419_vm0, %v553_v58, 0  ;;  %v1133_v58 = vld [vmem:[%s348_s5] sm:$0xff] }
  0xbc   : > { %v564_v60 = vsel %vm419_vm0, %v556_v59, 0  ;;  %v1134_v59 = vld [vmem:[%s348_s5 + $0x8] sm:$0xff] }
  0xbd   : > { %1346 = vmatmul.msk.bf16.vlgmr.msra.gmra.mxu2 %vm415_vm1, %v1427_v55  ;;  %590 = vmatpush.bf16.msrb.mxu3 %v564_v60  ;;  %v1662_v60 = vmov 0  }
  0xbe   : > { %1345 = vmatmul.msk.bf16.vlgmr.msra.gmra.mxu1 %vm415_vm1, %v1427_v55  ;;  %1539 = vset.pattern.permute.xlu0 %v1662_v60 }
  0xbf   : > { %524 = vmatpush.bf16.msrb.mxu1 %v487_v56  ;;  %1140 = vperm.xlu0 %1539, %v1133_v58  }
  0xc0   : > { %v407_v62 = vpop.permute.xlu0 %406  ;;  %1361 = vmatmul.msk.bf16.vlgmr.msrb.gmra.mxu3 %vm415_vm1, %v1428_v61  ;;  %1540 = vset.pattern.permute.xlu1 %v1662_v60 }
  0xc1   : > { %v413_v63 = vsel %vm412_vm2, %v407_v62, %v409_v52  ;;  %1145 = vperm.xlu1 %1540, %v1134_v59   ;;  %1541 = vset.pattern.permute.xlu2 %v1662_v60  ;;  %v1418_v62 = vld [vmem:[%s348_s5 + $0x18] sm:$0xff] }
  0xc2   : > { %v421_v1 = vsel %vm419_vm0, %v413_v63, 0  ;;  %v635_v6 = vpop.permute.xlu2 %634  ;;  %v1434_v63 = vld [vmem:[%s1818_s29 + $0x40] sm:$0xff] }
  0xc3   : > { %436 = vmatpush.bf16.msra.mxu0 %v421_v1 }
  0xc6   : > { %1344 = vmatmul.msk.bf16.vlgmr.msra.gmra.mxu0 %vm415_vm1, %v1427_v55 }
  0xc7   : > { %510 = vmatpush.bf16.msrb.mxu0 %v485_v0  ;;  %v1417_v0 = vld [vmem:[%s348_s5 + $0x10] sm:$0xff] }
  0xc8   : > { %1156 = vperm.xlu2 %1541, %v1417_v0  }
  0xc9   : > { %1161 = vperm.xlu1 %1540, %v1418_v62  }
  0xca   : > { %v549_v3 = vpop.permute.xlu1 %548  ;;  %v723_v15 = vpop.permute.xlu2 %722 }
  0xcb   : > { %604 = vmatpush.bf16.msra.mxu0 %v567_v2  ;;  %v555_v4 = vsel %vm554_vm3, %v549_v3, %v551_v50 }
  0xcc   : > { %v561_v5 = vsel %vm419_vm0, %v555_v4, 0 }
  0xcd   : > { %576 = vmatpush.bf16.msrb.mxu2 %v561_v5 }
  0xce   : > { %1353 = vmatmul.msk.bf16.vlgmr.msrb.gmra.mxu1 %vm415_vm1, %v1426_v49 }
  0xd0   : > { %1360 = vmatmul.msk.bf16.vlgmr.msrb.gmra.mxu2 %vm415_vm1, %v1428_v61 }
  0xd3   : > { %v639_v7 = vpop.permute.xlu1 %638 }
  0xd4   : > { %v653_v8 = vsel %vm419_vm0, %v639_v7, 0  ;;  %v637_v9 = vpop.permute.xlu0 %636 }
  0xd5   : > { %v642_v10 = vsel %vm640_vm4, %v637_v9, %v639_v7  ;;  %v641_v11 = vsel %vm640_vm4, %v635_v6, %v637_v9  ;;  %690 = vmatpush.bf16.msra.mxu3 %v653_v8 }
  0xd6   : > { %1352 = vmatmul.msk.bf16.vlgmr.msrb.gmra.mxu0 %vm415_vm1, %v1426_v49  ;;  %v650_v12 = vsel %vm419_vm0, %v642_v10, 0  ;;  %v647_v13 = vsel %vm419_vm0, %v641_v11, 0  ;;  %v498_v1 = vpop.f32.mrf.mxu3 }
  0xd7   : > { %662 = vmatpush.bf16.msra.mxu1 %v647_v13  ;;  %676 = vmatpush.bf16.msra.mxu2 %v650_v12  ;;  %v893_v23 = vpop.permute.xlu2 %892 }
  0xd8   : > { %1371 = vmatmul.msk.bf16.vlgmr.msra.gmra.mxu3 %vm415_vm1, %v1429_v14 }
  0xdc   : > { %v725_v16 = vpop.permute.xlu0 %724 }
  0xdd   : > { %v739_v17 = vsel %vm419_vm0, %v725_v16, 0  ;;  %v721_v18 = vpop.permute.xlu1 %720  ;;  %v728_v19 = vsel %vm726_vm5, %v723_v15, %v725_v16 }
  0xde   : > { %1369 = vmatmul.msk.bf16.vlgmr.msra.gmra.mxu1 %vm415_vm1, %v1429_v14  ;;  %v727_v20 = vsel %vm726_vm5, %v721_v18, %v723_v15  ;;  %v736_v21 = vsel %vm419_vm0, %v728_v19, 0  ;;  %776 = vmatpush.bf16.msrb.mxu2 %v739_v17  ;;  %v500_v7 = vpop.f32.mrf.mxu3 }
  0xdf   : > { %v733_v22 = vsel %vm419_vm0, %v727_v20, 0  ;;  %762 = vmatpush.bf16.msrb.mxu1 %v736_v21  ;;  %v897_v30 = vpop.permute.xlu2 %896 }
  0xe0   : > { %1370 = vmatmul.msk.bf16.vlgmr.msra.gmra.mxu2 %vm415_vm1, %v1429_v14  ;;  %748 = vmatpush.bf16.msrb.mxu0 %v733_v22  ;;  %v911_v40 = vsel %vm419_vm0, %v897_v30, 0 }
  0xe5   : > { %v809_v24 = vpop.permute.xlu1 %808  ;;  %v807_v25 = vpop.permute.xlu0 %806 }
  0xe6   : > { %1362 = vmatmul.msk.bf16.vlgmr.msra.gmra.mxu0 %vm415_vm1, %v1428_v61  ;;  %v813_v26 = vsel %vm812_vm6, %v807_v25, %v809_v24  ;;  %v1433_v61 = vld [vmem:[%s1818_s29 + $0x38] sm:$0xff]  ;;  %s1213_s29 = sshll.u32 %s1210_s23, 4  ;;  %s1214_s29 = int_to_ptr.hbm [resolvable:$true] %s1213_s29 }
  0xe7   : > { %v819_v27 = vsel %vm419_vm0, %v813_v26, 0  ;;  %v979_v41 = vpop.permute.xlu2 %978  ;;  %s1556_s5 = sshra.s32 %s1214_s29, 4  ;;  %s1557_s5 = int_to_ptr.hbm [resolvable:$true] %s1556_s5 }
  0xe8   : > { %834 = vmatpush.bf16.msrb.mxu3 %v819_v27  ;;  %s1558_s9 = scalar_lea.hbm %s1557_s5, 48  ;;  %p1563_p7 = scmp.lt.s32.totalorder %s1557_s5, %s1969_s3 }
  0xe9   : > { %p1559_p4 = scmp.ne.s32.totalorder %s1557_s5, %s1558_s9  ;;  %p1564_p8 = scmp.lt.s32.totalorder %s1562_s17, %s1558_s9 }
  0xeb   : > { %1387 = vmatmul.msk.bf16.vlgmr.msrb.gmra.mxu3 %vm415_vm1, %v1431_v28  ;;  %p1560_p5 = pnand %p1559_p4, %p1764_p10  ;;  %p1565_p9 = por %p1564_p8, %p1563_p7 }
  0xed   : > { %v811_v31 = vpop.permute.xlu1 %810  ;;  %p1561_p6 = pneg %p1560_p5 }
  0xee   : > { %1379 = vmatmul.msk.bf16.vlgmr.msrb.gmra.mxu1 %vm415_vm1, %v1430_v29  ;;  %v814_v32 = vsel %vm812_vm6, %v809_v24, %v811_v31  ;;  %v825_v33 = vsel %vm419_vm0, %v811_v31, 0  ;;  %v895_v34 = vpop.permute.xlu0 %894 }
  0xef   : > { %v822_v35 = vsel %vm419_vm0, %v814_v32, 0  ;;  %v899_v36 = vsel %vm898_vm7, %v893_v23, %v895_v34  ;;  %v900_v37 = vsel %vm898_vm7, %v895_v34, %v897_v30  ;;  %862 = vmatpush.bf16.msra.mxu1 %v825_v33  ;;  %v1067_v50 = vpop.permute.xlu2 %1066  ;;  %p1566_p11 = pnand %p1565_p9, %p1561_p6 }
  0xf0   : > { %1380 = vmatmul.msk.bf16.vlgmr.msrb.gmra.mxu2 %vm415_vm1, %v1430_v29  ;;  %v905_v38 = vsel %vm419_vm0, %v899_v36, 0  ;;  %v908_v39 = vsel %vm419_vm0, %v900_v37, 0  ;;  %848 = vmatpush.bf16.msra.mxu0 %v822_v35 }
  0xf1   : > { %920 = vmatpush.bf16.msra.mxu2 %v905_v38  ;;  %934 = vmatpush.bf16.msra.mxu3 %v908_v39 }
  0xf6   : > { %1378 = vmatmul.msk.bf16.vlgmr.msrb.gmra.mxu0 %vm415_vm1, %v1430_v29 }
  0xf7   : > { %v983_v42 = vpop.permute.xlu1 %982  ;;  %948 = vmatpush.bf16.msrb.mxu0 %v911_v40 }
  0xf8   : > { %v997_v43 = vsel %vm419_vm0, %v983_v42, 0  ;;  %v981_v44 = vpop.permute.xlu0 %980 }
  0xf9   : > { %v986_v46 = vsel %vm984_vm8, %v981_v44, %v983_v42  ;;  %v985_v47 = vsel %vm984_vm8, %v979_v41, %v981_v44  ;;  %1034 = vmatpush.bf16.msrb.mxu3 %v997_v43 }
  0xfa   : > { %v994_v48 = vsel %vm419_vm0, %v986_v46, 0  ;;  %v991_v49 = vsel %vm419_vm0, %v985_v47, 0 }
  0xfb   : > { %1397 = vmatmul.msk.bf16.vlgmr.msra.gmra.mxu3 %vm415_vm1, %v1432_v45  ;;  %1006 = vmatpush.bf16.msrb.mxu1 %v991_v49 }
  0xfc   : > { %1020 = vmatpush.bf16.msrb.mxu2 %v994_v48 }
  0xfe   : > { %1389 = vmatmul.msk.bf16.vlgmr.msra.gmra.mxu1 %vm415_vm1, %v1431_v28 }
 0x100   : > { %1396 = vmatmul.msk.bf16.vlgmr.msra.gmra.mxu2 %vm415_vm1, %v1432_v45  ;;  %v1069_v51 = vpop.permute.xlu0 %1068  ;;  %v1065_v52 = vpop.permute.xlu1 %1064 }
 0x101   : > { %v1083_v53 = vsel %vm419_vm0, %v1069_v51, 0  ;;  %v1072_v54 = vsel %vm1070_vm9, %v1067_v50, %v1069_v51  ;;  %v1071_v55 = vsel %vm1070_vm9, %v1065_v52, %v1067_v50 }
 0x102   : > { %v1080_v56 = vsel %vm419_vm0, %v1072_v54, 0  ;;  %1120 = vmatpush.bf16.msra.mxu2 %v1083_v53  ;;  %v1077_v57 = vsel %vm419_vm0, %v1071_v55, 0 }
 0x103   : > { %1106 = vmatpush.bf16.msra.mxu1 %v1080_v56 }
 0x106   : > { %1388 = vmatmul.msk.bf16.vlgmr.msra.gmra.mxu0 %vm415_vm1, %v1431_v28 }
 0x107   : > { %1092 = vmatpush.bf16.msra.mxu0 %v1077_v57 }
 0x10b   : > { %1407 = vmatmul.msk.bf16.vlgmr.msrb.gmra.mxu3 %vm415_vm1, %v1433_v61 }
 0x10e   : > { %1405 = vmatmul.msk.bf16.vlgmr.msrb.gmra.mxu1 %vm415_vm1, %v1433_v61 }
 0x110   : > { %1406 = vmatmul.msk.bf16.vlgmr.msrb.gmra.mxu2 %vm415_vm1, %v1433_v61 }
 0x116   : > { %1398 = vmatmul.msk.bf16.vlgmr.msrb.gmra.mxu0 %vm415_vm1, %v1432_v45 }
 0x11e   : > { %1415 = vmatmul.msk.bf16.vlgmr.msra.gmra.mxu1 %vm415_vm1, %v1434_v63 }
 0x120   : > { %1416 = vmatmul.msk.bf16.vlgmr.msra.gmra.mxu2 %vm415_vm1, %v1434_v63 }
 0x126   : > { %1414 = vmatmul.msk.bf16.vlgmr.msra.gmra.mxu0 %vm415_vm1, %v1434_v63 }
 0x13b   : > { %v452_v2 = vpop.f32.mrf.mxu1 }
 0x140   : > { %v466_v3 = vpop.f32.mrf.mxu2 }
 0x143   : > { %v438_v4 = vpop.f32.mrf.mxu0  ;;  %v454_v5 = vpop.f32.mrf.mxu1 }
 0x144   : > { %v499_v6 = vadd.f32 %v498_v1, %v438_v4  ;;  %v592_v13 = vpop.f32.mrf.mxu3  ;;  %v1141_v1 = vpop.permute.xlu0 %1140 }
 0x148   : > { %v468_v8 = vpop.f32.mrf.mxu2 }
 0x14b   : > { %v440_v9 = vpop.f32.mrf.mxu0  ;;  %v526_v10 = vpop.f32.mrf.mxu1 }
 0x14c   : > { %v527_v11 = vadd.f32 %v526_v10, %v466_v3  ;;  %v501_v12 = vadd.f32 %v500_v7, %v440_v9  ;;  %v594_v19 = vpop.f32.mrf.mxu3 }
 0x153   : > { %v578_v14 = vpop.f32.mrf.mxu2  ;;  %v512_v15 = vpop.f32.mrf.mxu0 }
 0x154   : > { %v611_v16 = vadd.f32 %v578_v14, %v499_v6  ;;  %v528_v17 = vpop.f32.mrf.mxu1  ;;  %v513_v44 = vadd.f32 %v512_v15, %v452_v2  ;;  %v1894_v2 = vpop.permute.xlu1 %1145 }
 0x155   : > { %v529_v18 = vadd.f32 %v528_v17, %v468_v8  ;;  %v1157_v15 = vpop.permute.xlu2 %1156 }
 0x156   : > { %v612_v48 = vadd.f32 %v592_v13, %v513_v44 }
 0x15b   : > { %v580_v20 = vpop.f32.mrf.mxu2  ;;  %v514_v21 = vpop.f32.mrf.mxu0 }
 0x15c   : > { %v614_v22 = vadd.f32 %v580_v20, %v501_v12  ;;  %v664_v23 = vpop.f32.mrf.mxu1  ;;  %v692_v24 = vpop.f32.mrf.mxu3  ;;  %v515_v51 = vadd.f32 %v514_v21, %v454_v5 }
 0x15d   : > { %v697_v59 = vadd.f32 %v664_v23, %v611_v16 }
 0x15e   : > { %v615_v58 = vadd.f32 %v594_v19, %v515_v51 }
 0x163   : > { %v678_v25 = vpop.f32.mrf.mxu2  ;;  %v606_v26 = vpop.f32.mrf.mxu0 }
 0x164   : > { %v666_v27 = vpop.f32.mrf.mxu1  ;;  %v694_v28 = vpop.f32.mrf.mxu3  ;;  %v698_v49 = vadd.f32 %v678_v25, %v612_v48  ;;  %v613_v55 = vadd.f32 %v606_v26, %v527_v11 }
 0x165   : > { %v700_v16 = vadd.f32 %v666_v27, %v614_v22 }
 0x166   : > { %v699_v60 = vadd.f32 %v692_v24, %v613_v55 }
 0x16b   : > { %v680_v29 = vpop.f32.mrf.mxu2  ;;  %v608_v30 = vpop.f32.mrf.mxu0 }
 0x16c   : > { %v764_v31 = vpop.f32.mrf.mxu1  ;;  %v701_v61 = vadd.f32 %v680_v29, %v615_v58  ;;  %v616_v3 = vadd.f32 %v608_v30, %v529_v18 }
 0x16d   : > { %v784_v52 = vadd.f32 %v764_v31, %v698_v49 }
 0x16e   : > { %v836_v35 = vpop.f32.mrf.mxu3  ;;  %v702_v17 = vadd.f32 %v694_v28, %v616_v3 }
 0x173   : > { %v778_v32 = vpop.f32.mrf.mxu2  ;;  %v750_v33 = vpop.f32.mrf.mxu0 }
 0x174   : > { %v766_v34 = vpop.f32.mrf.mxu1  ;;  %v785_v63 = vadd.f32 %v778_v32, %v699_v60  ;;  %v783_v0 = vadd.f32 %v750_v33, %v697_v59 }
 0x175   : > { %v787_v4 = vadd.f32 %v766_v34, %v701_v61 }
 0x176   : > { %v1890_v39 = vpop.f32.mrf.mxu3  ;;  %v869_v13 = vadd.f32 %v836_v35, %v783_v0 }
 0x17b   : > { %v780_v36 = vpop.f32.mrf.mxu2  ;;  %v752_v37 = vpop.f32.mrf.mxu0 }
 0x17c   : > { %v864_v38 = vpop.f32.mrf.mxu1  ;;  %v788_v20 = vadd.f32 %v780_v36, %v702_v17  ;;  %v786_v21 = vadd.f32 %v752_v37, %v700_v16 }
 0x17d   : > { %v871_v8 = vadd.f32 %v864_v38, %v785_v63 }
 0x17e   : > { %v936_v43 = vpop.f32.mrf.mxu3  ;;  %v872_v34 = vadd.f32 %v1890_v39, %v786_v21 }
 0x183   : > { %v922_v40 = vpop.f32.mrf.mxu2  ;;  %v850_v41 = vpop.f32.mrf.mxu0 }
 0x184   : > { %v866_v42 = vpop.f32.mrf.mxu1  ;;  %v870_v57 = vadd.f32 %v850_v41, %v784_v52  ;;  %v955_v18 = vadd.f32 %v922_v40, %v869_v13 }
 0x185   : > { %v874_v29 = vadd.f32 %v866_v42, %v788_v20  ;;  %v1162_v42 = vpop.permute.xlu1 %1161 }
 0x186   : > { %v938_v50 = vpop.f32.mrf.mxu3  ;;  %v956_v62 = vadd.f32 %v936_v43, %v870_v57 }
 0x18b   : > { %v1892_v45 = vpop.f32.mrf.mxu2  ;;  %v852_v46 = vpop.f32.mrf.mxu0 }
 0x18c   : > { %v1008_v47 = vpop.f32.mrf.mxu1  ;;  %v873_v11 = vadd.f32 %v852_v46, %v787_v4  ;;  %v958_v43 = vadd.f32 %v1892_v45, %v872_v34 }
 0x18d   : > { %v1041_v25 = vadd.f32 %v1008_v47, %v955_v18 }
 0x18e   : > { %v1036_v9 = vpop.f32.mrf.mxu3  ;;  %v959_v23 = vadd.f32 %v938_v50, %v873_v11 }
 0x193   : > { %v1022_v53 = vpop.f32.mrf.mxu2  ;;  %v950_v54 = vpop.f32.mrf.mxu0 }
 0x194   : > { %v1010_v56 = vpop.f32.mrf.mxu1  ;;  %v1042_v5 = vadd.f32 %v1022_v53, %v956_v62  ;;  %v957_v14 = vadd.f32 %v950_v54, %v871_v8 }
 0x195   : > { %v1044_v48 = vadd.f32 %v1010_v56, %v958_v43 }
 0x196   : > { %v1043_v26 = vadd.f32 %v1036_v9, %v957_v14  ;;  %v1038_v38 = vpop.f32.mrf.mxu3 }
 0x19b   : > { %v1024_v6 = vpop.f32.mrf.mxu2  ;;  %v952_v7 = vpop.f32.mrf.mxu0 }
 0x19c   : > { %v1108_v10 = vpop.f32.mrf.mxu1  ;;  %v1045_v30 = vadd.f32 %v1024_v6, %v959_v23  ;;  %v960_v35 = vadd.f32 %v952_v7, %v874_v29 }
 0x19d   : > { %v1128_v12 = vadd.f32 %v1108_v10, %v1042_v5 }
 0x19e   : > { %v1046_v39 = vadd.f32 %v1038_v38, %v960_v35 }
 0x19f   : > { %v1149_v19 = vmul.f32 %v1141_v1, %v1128_v12 }
 0x1a1   : > { %v1165_v24 = vadd.f32 %v1157_v15, %v1149_v19 }
 0x1a3   : > { %vm1171_vm10 = vcmp.ge.f32.partialorder %v1165_v24, 0.0  ;;  %v1177_v31 = vmul.f32 0.01, %v1165_v24  ;;  %v1122_v32 = vpop.f32.mrf.mxu2  ;;  %v1094_v33 = vpop.f32.mrf.mxu0 }
 0x1a4   : > { %v1129_v22 = vadd.f32 %v1122_v32, %v1043_v26  ;;  %v1127_v27 = vadd.f32 %v1094_v33, %v1041_v25  ;;  %v1110_v28 = vpop.f32.mrf.mxu1 }
 0x1a5   : > { %v1183_v36 = vsel %vm1171_vm10, %v1165_v24, %v1177_v31  ;;  %v1131_v37 = vadd.f32 %v1110_v28, %v1045_v30 }
 0x1a6   : > { %1189 = vst [vmem:[%s1902_s22 + $0x8] sm:$0xff] %v1183_v36  ;;  %v1150_v40 = vmul.f32 %v1141_v1, %v1129_v22  ;;  %v1148_v41 = vmul.f32 %v1141_v1, %v1127_v27 }
 0x1a7   : > { %v1152_v44 = vmul.f32 %v1894_v2, %v1131_v37 }
 0x1a8   : > { %v1166_v46 = vadd.f32 %v1157_v15, %v1150_v40  ;;  %v1164_v47 = vadd.f32 %v1157_v15, %v1148_v41 }
 0x1a9   : > { %v1168_v49 = vadd.f32 %v1162_v42, %v1152_v44 }
 0x1aa   : > { %vm1172_vm12 = vcmp.ge.f32.partialorder %v1166_v46, 0.0  ;;  %v1178_v50 = vmul.f32 0.01, %v1166_v46  ;;  %vm1170_vm13 = vcmp.ge.f32.partialorder %v1164_v47, 0.0  ;;  %v1176_v51 = vmul.f32 0.01, %v1164_v47 }
 0x1ab   : > { %vm1174_vm14 = vcmp.ge.f32.partialorder %v1168_v49, 0.0  ;;  %v1180_v52 = vmul.f32 0.01, %v1168_v49  ;;  %v1124_v45 = vpop.f32.mrf.mxu2  ;;  %v1096_v53 = vpop.f32.mrf.mxu0 }
 0x1ac   : > { %v1184_v54 = vsel %vm1172_vm12, %v1166_v46, %v1178_v50  ;;  %v1182_v55 = vsel %vm1170_vm13, %v1164_v47, %v1176_v51  ;;  %v1132_v57 = vadd.f32 %v1124_v45, %v1046_v39  ;;  %v1130_v56 = vadd.f32 %v1096_v53, %v1044_v48 }
 0x1ad   : > { %1191 = vst.msk [vmem:[%s1902_s22 + $0x10] sm:$0xff] %vm1190_vm11, %v1184_v54  ;;  %v1186_v58 = vsel %vm1174_vm14, %v1168_v49, %v1180_v52 }
 0x1ae   : > { %1188 = vst [vmem:[%s1902_s22] sm:$0xff] %v1182_v55  ;;  %v1153_v59 = vmul.f32 %v1894_v2, %v1132_v57  ;;  %v1151_v60 = vmul.f32 %v1894_v2, %v1130_v56 }
 0x1af   : > { %1193 = vst [vmem:[%s1902_s22 + $0x20] sm:$0xff] %v1186_v58 }
 0x1b0   : > { %v1169_v61 = vadd.f32 %v1162_v42, %v1153_v59  ;;  %v1167_v62 = vadd.f32 %v1162_v42, %v1151_v60 }
 0x1b2   : > { %vm1175_vm15 = vcmp.ge.f32.partialorder %v1169_v61, 0.0  ;;  %v1181_v63 = vmul.f32 0.01, %v1169_v61  ;;  %vm1173_vm0 = vcmp.ge.f32.partialorder %v1167_v62, 0.0  ;;  %v1179_v0 = vmul.f32 0.01, %v1167_v62 }
 0x1b4   : > { %v1187_v1 = vsel %vm1175_vm15, %v1169_v61, %v1181_v63  ;;  %v1185_v3 = vsel %vm1173_vm0, %v1167_v62, %v1179_v0 }
 0x1b5   : > { %1194 = vst.msk [vmem:[%s1902_s22 + $0x28] sm:$0xff] %vm1190_vm11, %v1187_v1 }
 0x1b6   : > { %1192 = vst [vmem:[%s1902_s22 + $0x18] sm:$0xff] %v1185_v3 }
 0x1b7   : > { %1569 = shalt.err (!%p1566_p11)
}
 0x1b8   : > { %s1663_s15 = smov 384   ;;  %s1664_s22 = smov 24  }
 0x1b9   : > { %1441 = dma.vmem_to_hbm [thread:$0]  (%p1764_p10), %s1212_s27, 768, %s1214_s29, %s1196_s4, %s1663_s15, %s1663_s15, %s1664_s22  }
 0x1ba PF: > { %p1447_p13 = scmp.ge.s32.totalorder %s1652_s21, 2  ;;  %s1228_s26 = sand.u32 1, %s1616_s12  }
 0x1bb   : > { %s1229_s23 = scalar_lea.sflag [#allocation5], %s1228_s26 }
 0x1bc   : > { %p1444_p0 = pnand %p1447_p13, %p1771_p12 }
 0x1be   : > { %p1445_p1 = pneg %p1444_p0 }
 0x1c0   : > { %1611 = dma.done.wait (%p1445_p1), %s1229_s23, 768  }
 0x1c1   : > { %1613 = vsyncadd (%p1445_p1), %s1229_s23, 4294966528  ;;  %s16_s21 = sadd.s32 1, %s1652_s21   ;;  %s1973_s12 = smov %s1620_s13 }
 0x1c2   : > { %p13_p2 = scmp.ge.s32.totalorder %s16_s21, 6   ;;  %s1974_s13 = smov %s1624_s14 }
 0x1c3   : > { %s1975_s14 = smov %s1769_s7  ;;  %s1976_s15 = smov %s1632_s16 }
 0x1c4   : > { %s1977_s16 = smov %s1758_s30  ;;  %s1978_s17 = smov %s1644_s19 }
 0x1c5   : > { %s1979_s18 = smov %s1648_s20  ;;  %s1980_s19 = smov %s1983_s24 }
 0x1c6   : > { %s1981_s20 = smov %s1987_s25  ;;  %15 = sbr.rel (!%p13_p2) target bundleno = 6 (0x6), region = 171 }
 0x1cb   :  { %1235 = vsyncpa [#allocation5], 1 }
 0x1cc   :  { %1237 = vsyncpa [#allocation5 + $0x1], 1 }

</bundles_post_ra>
